<compile_context>
chip_gen: v7x
topology: tpu7x:2x2x1
jax: 0.10.0
libtpu: 0.0.40
codegen_flags: <defaults>
</compile_context>

<pallas_src>
import functools

import jax
import jax.numpy as jnp
from jax.experimental import pallas as pl
from jax.experimental.pallas import tpu as pltpu


def _quantile_loss_kernel(x_ref, out_ref, acc_ref, *, quantiles, batch,
                          tile_b, chunks_per_core):
    """Grid = (num_core_splits ["parallel"], chunks_per_core ["arbitrary"]).

    x_ref   : (Q+1, tile_b) VMEM — rows 0..Q-1 = preds^T tile, row Q = target.
    out_ref : (1, 8, 128)   VMEM — this core-split's partial pinball sum
                                   (scalar broadcast into a lane-dense block).
    acc_ref : (Q+1, tile_b) f32 VMEM scratch — elementwise partial sums.
    """
    qp = acc_ref.shape[0]                      # Q + 1 (target rides as last row)
    c = pl.program_id(0)                       # core-split index ("parallel")
    i = pl.program_id(1)                       # lane-chunk index ("arbitrary")

    @pl.when(i == 0)
    def _():
        acc_ref[...] = jnp.zeros_like(acc_ref)

    # (Q+1, 1) quantile column from scalar literals + iota — no captured array
    # constant.  Row Q keeps q == 0; its error is identically 0 anyway.
    row = jax.lax.broadcasted_iota(jnp.int32, (qp, 1), 0)
    q_col = jnp.zeros((qp, 1), jnp.float32)
    for r, qv in enumerate(quantiles):
        q_col = jnp.where(row == r, qv, q_col)

    x = x_ref[...].astype(jnp.float32)          # (Q+1, TB); cast after DMA (bf16-friendly)
    t = x[qp - 1:qp, :]                         # (1, TB) target row
    e = t - x                                   # errors; row Q is exactly 0
    # pinball(q, e) = max((q-1)*e, q*e) = q*e + max(-e, 0)
    pin = q_col * e + jnp.maximum(-e, 0.0)      # (Q+1, TB)

    # Logical (unclamped) chunk id.  The index_map clamps the *block* index, so
    # out-of-range tail chunks re-read valid data; the mask (driven by the
    # unclamped id) zeroes their contribution exactly.
    chunk = c * chunks_per_core + i
    fully_valid = (chunk + 1) * tile_b <= batch

    @pl.when(fully_valid)
    def _():                                    # hot path: pure VALU accumulate
        acc_ref[...] += pin

    @pl.when(jnp.logical_not(fully_valid))
    def _():                                    # partial / out-of-range tail chunk
        lane = jax.lax.broadcasted_iota(jnp.int32, pin.shape, 1)
        in_bounds = chunk * tile_b + lane < batch
        acc_ref[...] += jnp.where(in_bounds, pin, 0.0)

    @pl.when(i == pl.num_programs(1) - 1)
    def _():
        # One cross-lane/sublane reduce per core-split; broadcast the scalar
        # into this split's private lane-dense output block.
        out_ref[...] = jnp.zeros_like(out_ref) + jnp.sum(acc_ref[...])


def _round_up(x, m):
    return ((x + m - 1) // m) * m


def quantile_loss(preds, target, quantiles, *, max_tile_b=131072,
                  num_core_splits=2):
    """preds: (B, Q) float, target: (B,) float, quantiles: static tuple of Q floats."""
    B, Q = preds.shape
    assert len(quantiles) == Q
    assert target.shape == (B,)

    # Single producing expression: transpose preds and ride the target as one
    # extra sublane row -> (Q+1, B), in the *native* dtype (no wrapper upcast).
    # TODO(synk): have the upstream model emit this (Q+1, B) layout directly so
    # even this one relayout disappears.
    stacked = jnp.concatenate(
        [preds.T, target.reshape(1, B).astype(preds.dtype)], axis=0)

    tile_b = int(min(_round_up(B, 128), max_tile_b))
    num_chunks = pl.cdiv(B, tile_b)                     # no jnp.pad: tail masked in-kernel
    chunks_per_core = pl.cdiv(num_chunks, num_core_splits)

    def x_index_map(c, i):
        # Clamp: a core-split's out-of-range tail chunk re-reads the last valid
        # chunk; it is fully masked inside the kernel.
        return (0, jnp.minimum(c * chunks_per_core + i, num_chunks - 1))

    kernel = functools.partial(
        _quantile_loss_kernel,
        quantiles=tuple(float(q) for q in quantiles),
        batch=B, tile_b=tile_b, chunks_per_core=chunks_per_core)

    partials = pl.pallas_call(
        kernel,
        out_shape=jax.ShapeDtypeStruct((num_core_splits, 8, 128), jnp.float32),
        grid_spec=pltpu.PrefetchScalarGridSpec(
            num_scalar_prefetch=0,
            grid=(num_core_splits, chunks_per_core),
            in_specs=[pl.BlockSpec((Q + 1, tile_b), x_index_map)],
            out_specs=pl.BlockSpec((1, 8, 128), lambda c, i: (c, 0, 0)),
            scratch_shapes=[pltpu.VMEM((Q + 1, tile_b), jnp.float32)],
        ),
        # "parallel" core-split axis -> ~2x on v7x megacore; runs serially
        # (and stays correct: per-split init + per-split output block) on
        # single-TensorCore v5e/v6e.  Raise vmem_limit_bytes if max_tile_b is
        # pushed past ~131072 on v6e/v7x.
        compiler_params=pltpu.CompilerParams(
            dimension_semantics=("parallel", "arbitrary")),
    )(stacked)

    # torch.mean(torch.sum(cat(losses, 1), 1)) == total pinball sum / batch.
    return jnp.sum(partials[:, 0, 0]) / B


def quantile_loss_ref(preds, target, quantiles):
    """Pure-JAX reference matching the PyTorch forward exactly."""
    losses = []
    for i, q in enumerate(quantiles):
        errors = target - preds[:, i]
        losses.append(jnp.maximum((q - 1.0) * errors, q * errors)[:, None])
    return jnp.mean(jnp.sum(jnp.concatenate(losses, axis=1), axis=1))


if __name__ == "__main__":
    quantiles = (0.1, 0.5, 0.9, 0.95)   # module __init__ argument, fixed in-script
    B, Q = 32, len(quantiles)

    key = jax.random.PRNGKey(0)
    kp, kt = jax.random.split(key)
    preds = jax.random.normal(kp, (B, Q), dtype=jnp.float32)
    target = jax.random.normal(kt, (B,), dtype=jnp.float32)

    loss = jax.block_until_ready(quantile_loss(preds, target, quantiles))
    ref = jax.block_until_ready(quantile_loss_ref(preds, target, quantiles))
    assert jnp.allclose(loss, ref, rtol=1e-5, atol=1e-5), (loss, ref)

    print("KERNEL_OK")
</pallas_src>

<mosaic_0001>
module attributes {stable_mosaic.version = 11 : i64} {
  func.func @_quantile_loss_kernel(%arg0: i32, %arg1: i32, %arg2: memref<5x128xf32, #tpu.memory_space<vmem>>, %arg3: memref<1x8x128xf32, #tpu.memory_space<vmem>>, %arg4: memref<5x128xf32, #tpu.memory_space<vmem>>) attributes {dimension_semantics = [#tpu.dimension_semantics<parallel>, #tpu.dimension_semantics<arbitrary>], iteration_bounds = array<i64: 2, 1>, scalar_prefetch = 0 : i64, scratch_operands = 1 : i64, tpu.core_type = #tpu.core_type<tc>, window_params = [{transform_indices = @transform_0, window_bounds = array<i64: 5, 128>}, {transform_indices = @transform_1, window_bounds = array<i64: 1, 8, 128>}]} {
    %c0_i32 = arith.constant 0 : i32
    %0 = arith.cmpi eq, %arg1, %c0_i32 : i32
    %1 = arith.extui %0 : i1 to i32
    %c0_i32_0 = arith.constant 0 : i32
    %2 = arith.cmpi ne, %1, %c0_i32_0 : i32
    scf.if %2 {
      %cst_15 = arith.constant 0.000000e+00 : f32
      %45 = vector.broadcast %cst_15 : f32 to vector<5x128xf32>
      %c0_16 = arith.constant 0 : index
      %c0_17 = arith.constant 0 : index
      %46 = vector.load %arg4[%c0_16, %c0_17] : memref<5x128xf32, #tpu.memory_space<vmem>>, vector<5x128xf32>
      tpu.vector_store %arg4[%c0_16, %c0_17], %45 {strides = array<i32>} : memref<5x128xf32, #tpu.memory_space<vmem>>, vector<5x128xf32>,
    } else {
    }
    %3 = tpu.iota {dimensions = array<i32: 0>} : vector<5x1xi32>
    %cst = arith.constant 0.000000e+00 : f32
    %4 = vector.broadcast %cst : f32 to vector<5x1xf32>
    %c0_i32_1 = arith.constant 0 : i32
    %5 = vector.broadcast %c0_i32_1 : i32 to vector<5x1xi32>
    %6 = arith.cmpi eq, %3, %5 : vector<5x1xi32>
    %cst_2 = arith.constant 1.000000e-01 : f32
    %7 = vector.broadcast %cst_2 : f32 to vector<5x1xf32>
    %8 = arith.select %6, %7, %4 : vector<5x1xi1>, vector<5x1xf32>
    %c1_i32 = arith.constant 1 : i32
    %9 = vector.broadcast %c1_i32 : i32 to vector<5x1xi32>
    %10 = arith.cmpi eq, %3, %9 : vector<5x1xi32>
    %cst_3 = arith.constant 5.000000e-01 : f32
    %11 = vector.broadcast %cst_3 : f32 to vector<5x1xf32>
    %12 = arith.select %10, %11, %8 : vector<5x1xi1>, vector<5x1xf32>
    %c2_i32 = arith.constant 2 : i32
    %13 = vector.broadcast %c2_i32 : i32 to vector<5x1xi32>
    %14 = arith.cmpi eq, %3, %13 : vector<5x1xi32>
    %cst_4 = arith.constant 0.899999976 : f32
    %15 = vector.broadcast %cst_4 : f32 to vector<5x1xf32>
    %16 = arith.select %14, %15, %12 : vector<5x1xi1>, vector<5x1xf32>
    %c3_i32 = arith.constant 3 : i32
    %17 = vector.broadcast %c3_i32 : i32 to vector<5x1xi32>
    %18 = arith.cmpi eq, %3, %17 : vector<5x1xi32>
    %cst_5 = arith.constant 0.949999988 : f32
    %19 = vector.broadcast %cst_5 : f32 to vector<5x1xf32>
    %20 = arith.select %18, %19, %16 : vector<5x1xi1>, vector<5x1xf32>
    %c0 = arith.constant 0 : index
    %c0_6 = arith.constant 0 : index
    %21 = vector.load %arg2[%c0, %c0_6] : memref<5x128xf32, #tpu.memory_space<vmem>>, vector<5x128xf32>
    %22 = vector.extract_strided_slice %21 {offsets = [4, 0], sizes = [1, 128], strides = [1, 1]} : vector<5x128xf32> to vector<1x128xf32>
    %23 = vector.broadcast %22 : vector<1x128xf32> to vector<5x128xf32>
    %24 = arith.subf %23, %21 : vector<5x128xf32>
    %25 = vector.broadcast %20 : vector<5x1xf32> to vector<5x128xf32>
    %26 = arith.mulf %25, %24 : vector<5x128xf32>
    %cst_7 = arith.constant 0.000000e+00 : f32
    %27 = vector.broadcast %cst_7 : f32 to vector<5x128xf32>
    %28 = arith.subf %27, %24 : vector<5x128xf32>
    %cst_8 = arith.constant 0.000000e+00 : f32
    %29 = vector.broadcast %cst_8 : f32 to vector<5x128xf32>
    %30 = arith.maximumf %28, %29 : vector<5x128xf32>
    %31 = arith.addf %26, %30 : vector<5x128xf32>
    %c1_i32_9 = arith.constant 1 : i32
    %32 = arith.muli %arg0, %c1_i32_9 : i32
    %33 = arith.addi %32, %arg1 : i32
    %c1_i32_10 = arith.constant 1 : i32
    %34 = arith.addi %33, %c1_i32_10 : i32
    %c128_i32 = arith.constant 128 : i32
    %35 = arith.muli %34, %c128_i32 : i32
    %c32_i32 = arith.constant 32 : i32
    %36 = arith.cmpi sle, %35, %c32_i32 : i32
    %37 = arith.extui %36 : i1 to i32
    %c0_i32_11 = arith.constant 0 : i32
    %38 = arith.cmpi ne, %37, %c0_i32_11 : i32
    scf.if %38 {
      %c0_15 = arith.constant 0 : index
      %c0_16 = arith.constant 0 : index
      %45 = vector.load %arg4[%c0_15, %c0_16] : memref<5x128xf32, #tpu.memory_space<vmem>>, vector<5x128xf32>
      %46 = arith.addf %45, %31 : vector<5x128xf32>
      %c0_17 = arith.constant 0 : index
      %c0_18 = arith.constant 0 : index
      %47 = vector.load %arg4[%c0_17, %c0_18] : memref<5x128xf32, #tpu.memory_space<vmem>>, vector<5x128xf32>
      tpu.vector_store %arg4[%c0_17, %c0_18], %46 {strides = array<i32>} : memref<5x128xf32, #tpu.memory_space<vmem>>, vector<5x128xf32>,
    } else {
    }
    %true = arith.constant true
    %39 = arith.xori %36, %true : i1
    %40 = arith.extui %39 : i1 to i32
    %c0_i32_12 = arith.constant 0 : i32
    %41 = arith.cmpi ne, %40, %c0_i32_12 : i32
    scf.if %41 {
      %45 = tpu.iota {dimensions = array<i32: 1>} : vector<5x128xi32>
      %c128_i32_15 = arith.constant 128 : i32
      %46 = arith.muli %33, %c128_i32_15 : i32
      %47 = vector.broadcast %46 : i32 to vector<5x128xi32>
      %48 = arith.addi %47, %45 : vector<5x128xi32>
      %c32_i32_16 = arith.constant 32 : i32
      %49 = vector.broadcast %c32_i32_16 : i32 to vector<5x128xi32>
      %50 = arith.cmpi slt, %48, %49 : vector<5x128xi32>
      %c0_17 = arith.constant 0 : index
      %c0_18 = arith.constant 0 : index
      %51 = vector.load %arg4[%c0_17, %c0_18] : memref<5x128xf32, #tpu.memory_space<vmem>>, vector<5x128xf32>
      %cst_19 = arith.constant 0.000000e+00 : f32
      %52 = vector.broadcast %cst_19 : f32 to vector<5x128xf32>
      %53 = arith.select %50, %31, %52 : vector<5x128xi1>, vector<5x128xf32>
      %54 = arith.addf %51, %53 : vector<5x128xf32>
      %c0_20 = arith.constant 0 : index
      %c0_21 = arith.constant 0 : index
      %55 = vector.load %arg4[%c0_20, %c0_21] : memref<5x128xf32, #tpu.memory_space<vmem>>, vector<5x128xf32>
      tpu.vector_store %arg4[%c0_20, %c0_21], %54 {strides = array<i32>} : memref<5x128xf32, #tpu.memory_space<vmem>>, vector<5x128xf32>,
    } else {
    }
    %c0_i32_13 = arith.constant 0 : i32
    %42 = arith.cmpi eq, %arg1, %c0_i32_13 : i32
    %43 = arith.extui %42 : i1 to i32
    %c0_i32_14 = arith.constant 0 : i32
    %44 = arith.cmpi ne, %43, %c0_i32_14 : i32
    scf.if %44 {
      %cst_15 = arith.constant 0.000000e+00 : f32
      %45 = vector.broadcast %cst_15 : f32 to vector<1x8x128xf32>
      %c0_16 = arith.constant 0 : index
      %c0_17 = arith.constant 0 : index
      %46 = vector.load %arg4[%c0_16, %c0_17] : memref<5x128xf32, #tpu.memory_space<vmem>>, vector<5x128xf32>
      %47 = vector.shape_cast %46 : vector<5x128xf32> to vector<1x5x128xf32>
      %cst_18 = arith.constant dense<0.000000e+00> : vector<1xf32>
      %48 = vector.multi_reduction <add>, %47, %cst_18 [1, 2] : vector<1x5x128xf32> to vector<1xf32>
      %49 = vector.shape_cast %48 : vector<1xf32> to vector<1x1x1xf32>
      %50 = vector.extract %49[0, 0, 0] : f32 from vector<1x1x1xf32>
      %51 = vector.broadcast %50 : f32 to vector<1x8x128xf32>
      %52 = arith.addf %45, %51 : vector<1x8x128xf32>
      %c0_19 = arith.constant 0 : index
      %c0_20 = arith.constant 0 : index
      %c0_21 = arith.constant 0 : index
      %53 = vector.load %arg3[%c0_19, %c0_20, %c0_21] : memref<1x8x128xf32, #tpu.memory_space<vmem>>, vector<1x8x128xf32>
      tpu.vector_store %arg3[%c0_19, %c0_20, %c0_21], %52 {strides = array<i32>} : memref<1x8x128xf32, #tpu.memory_space<vmem>>, vector<1x8x128xf32>,
    } else {
    }
    return
  }
  func.func @transform_0(%arg0: i32, %arg1: i32) -> (i32, i32) {
    %c1_i32 = arith.constant 1 : i32
    %0 = arith.muli %arg0, %c1_i32 : i32
    %1 = arith.addi %0, %arg1 : i32
    %c0_i32 = arith.constant 0 : i32
    %2 = arith.minsi %1, %c0_i32 : i32
    %c0_i32_0 = arith.constant 0 : i32
    %c0_i32_1 = arith.constant 0 : i32
    return %c0_i32_0, %2 : i32, i32
  }
  func.func @transform_1(%arg0: i32, %arg1: i32) -> (i32, i32, i32) {
    %c0_i32 = arith.constant 0 : i32
    %c0_i32_0 = arith.constant 0 : i32
    %c0_i32_1 = arith.constant 0 : i32
    return %arg0, %c0_i32, %c0_i32_0 : i32, i32, i32
  }
}

</mosaic_0001>

<bundles_post_ra>
// kernel: tpu_custom_call.1
= control target key start
LH: loop header
LB: loop body
LE: loop exit
PB: predicated region body
PF: predicated region fallthrough
CT: control target
= control target key end

     0   :  { %6 = vsyncpa [#allocation4], 0  ;;  %s752_s0 = inlined_call_operand.hbm [shape: f32[5,32], index: 0, kind: input, shape index: {}]   ;;  %s753_s1 = inlined_call_operand.hbm [shape: f32[2,8,128], index: 1, kind: output, shape index: {}]  }
   0x1   :  { %8 = vsyncpa [#allocation4 + $0x1], 0 }
   0x2   :  { %9 = vsyncpa [#allocation5], 0 }
   0x3   :  { %11 = vsyncpa [#allocation5 + $0x1], 0  ;;  %s571_s6 = smov 0   ;;  %s573_s7 = smov 0  }
   0x4   :  { %s575_s8 = smov 0   ;;  %s577_s9 = smov 0  }
   0x5   :  { %s579_s10 = smov 0   ;;  %s581_s11 = smov 0  }
   0x6   :  { %s583_s12 = smov 0   ;;  %s585_s13 = smov 0  }
   0x7 LB: > { %s315_s14 = sadd.s32 4294967295, %s556_s13   ;;  %s316_s15 = sadd.s32 4294967294, %s556_s13   ;;  %s556_s13 = sphi %s585_s13, %s17_s13   ;;  %s552_s12 = sphi %s583_s12, %s774_s12   ;;  %s548_s11 = sphi %s581_s11, %s773_s11   ;;  %s544_s10 = sphi %s579_s10, %s742_s10   ;;  %s540_s9 = sphi %s577_s9, %s772_s9   ;;  %s536_s8 = sphi %s575_s8, %s771_s8   ;;  %s532_s7 = sphi %s573_s7, %s770_s7   ;;  %s528_s6 = sphi %s571_s6, %s769_s6  }
   0x8   : > { %s29_s16 = sadd.s32 1, %s552_s12  ;;  %p525_p1 = scmp.ne.s32.totalorder %s544_s10, 0 }
   0x9   : > { %p31_p0 = scmp.ge.s32.totalorder %s29_s16, 2  ;;  %p50_p2 = scmp.eq.s32.totalorder %s556_s13, 0 }
   0xa   : > { %p55_p3 = scmp.ne.s32.totalorder %s544_s10, %s540_s9  ;;  %p56_p5 = scmp.eq.s32.totalorder %s315_s14, 0 }
   0xb   : > { %s776_s16 = smov (%p31_p0, %s29_s16), 0  ;;  %p617_p4 = por %p525_p1, %p50_p2 }
   0xc   : > { %p621_p6 = por %p56_p5, %p55_p3  ;;  %s65_s19 = ssub.s32 %s552_s12, %s776_s16 }
   0xd   : > { %p66_p7 = scmp.eq.s32.totalorder %s65_s19, 0  ;;  %s68_s20 = sadd.s32 1, %s536_s8 }
   0xe   : > { %s758_s18 = scalar_select %p621_p6, 1, 0 }
   0xf   : > { %s629_s21 = scalar_select %p66_p7, %s536_s8, %s68_s20  }
  0x10   : > { %p78_p8 = scmp.ne.s32.totalorder %s536_s8, %s532_s7  ;;  %p79_p9 = scmp.eq.s32.totalorder %s315_s14, 1 }
  0x11   : > { %p84_p10 = scmp.ne.s32.totalorder %s532_s7, %s528_s6  ;;  %p85_p11 = scmp.eq.s32.totalorder %s316_s15, 1 }
  0x12   : > { %p635_p12 = por %p79_p9, %p78_p8  ;;  %p348_p1 = scmp.lt.s32.totalorder %s556_s13, 2 }
  0x13   : > { %p640_p0 = por %p85_p11, %p84_p10  ;;  %s558_s24 = smov [#allocation3]  }
  0x14   : > { %s759_s22 = scalar_select %p635_p12, 1, 0 }
  0x15   : > { %s760_s23 = scalar_select %p640_p0, 1, 0 }
  0x16   : > { %s119_s25 = sshll.u32 %s558_s24, 4  ;;  %p647_p2 = pnand %p348_p1, %p617_p4  ;;  %s120_s25 = int_to_ptr.vmem [resolvable:$true] %s119_s25 }
  0x17   : > { %s423_s29 = scalar_lea.hbm %s752_s0, 128 }
  0x18   : > { %s761_s26 = scalar_select %p647_p2, 1, 0 }
  0x19   : > { %p424_p7 = scmp.ne.s32.totalorder %s752_s0, %s423_s29  ;;  %p425_p8 = pneg %p647_p2 }
  0x1a   : > { %p430_p4 = scmp.lt.u32.totalorder %s423_s29, %s423_s29  ;;  %p432_p11 = scmp.lt.u32.totalorder %s423_s29, %s752_s0 }
  0x1b   : > { %p426_p9 = pnand %p425_p8, %p424_p7 }
  0x1c   : > { %p433_p1 = por %p432_p11, %p430_p4 }
  0x1d   : > { %p427_p10 = pneg %p426_p9 }
  0x1f   : > { %p434_p13 = pnand %p433_p1, %p427_p10 }
  0x21   : > { %437 = shalt.err (!%p434_p13)
}
  0x22   : > { %s438_s5 = scalar_lea.vmem %s120_s25, 128  ;;  %s445_s9 = scalar_lea.vmem %s120_s25, 256 }
  0x23   : > { %p439_p3 = scmp.ne.s32.totalorder %s120_s25, %s438_s5  ;;  %p446_p12 = scmp.lt.s32.totalorder %s120_s25, %s120_s25 }
  0x24   : > { %p447_p6 = scmp.lt.s32.totalorder %s445_s9, %s438_s5 }
  0x25   : > { %p441_p5 = pnand %p439_p3, %p425_p8 }
  0x26   : > { %p448_p2 = por %p447_p6, %p446_p12 }
  0x27   : > { %p442_p0 = pneg %p441_p5 }
  0x29   : > { %p449_p7 = pnand %p448_p2, %p442_p0 }
  0x2b   : > { %452 = shalt.err (!%p449_p7)
}
  0x2c   : > { %p762_p9 = scmp.ne.s32.totalorder %s761_s26, 0  ;;  %p763_p10 = scmp.lt.s32.totalorder %s556_s13, 3 }
  0x2d   : > { %p764_p13 = scmp.ge.s32.totalorder %s556_s13, 1 }
  0x2e   : > { %343 = dma.hbm_to_vmem [thread:$0]  (!%p762_p9), %s752_s0, 128, %s120_s25, [#allocation4]  }
  0x2f   : > { %p125_p4 = pnand %p764_p13, %p763_p10 }
  0x30   : > { %s130_s17 = sand.u32 (!%p125_p4), 1, %s544_s10   ;;  %p765_p6 = scmp.ne.s32.totalorder (!%p125_p4), %s758_s18, 0 }
  0x31   : > { %128 = sbr.rel (%p125_p4) target bundleno = 313 (0x139), region = 24  ;;  %s322_s19 = sshll.u32 (!%p125_p4), %s130_s17, 3 }
  0x32   : > { %s131_s20 = scalar_lea.sflag (!%p125_p4), [#allocation4], %s130_s17  ;;  %s134_s24 = scalar_lea.vmem (!%p125_p4), [#allocation3], %s322_s19 }
  0x38   : > { %518 = dma.done.wait (%p765_p6), %s131_s20, 128  }
  0x39   : > { %520 = vsyncadd (%p765_p6), %s131_s20, 4294967168  ;;  %v161_v0 = vlaneseq  ;;  %s150_s25 = sand.u32 1, %s532_s7   ;;  %s680_s26 = sshll.u32 %s548_s11, 7  ;;  %v559_v1 = vmov 0.0   ;;  %v171_v6 = vld [vmem:[%s134_s24] sm:$0x1f] }
  0x3a   : > { %s684_s27 = sshll.u32 %s150_s25, 3  ;;  %160 = vst [vmem:[#allocation2] sm:$0x1f] %v559_v1  ;;  %s333_s28 = sadd.s32 128, %s680_s26 }
  0x3b   : > { %v162_v2 = vshrl.u32 %v161_v0, 7  ;;  %s152_s11 = scalar_lea.vmem [#allocation6], %s684_s27  ;;  %p325_p12 = scmp.gt.s32.totalorder %s333_s28, 32 }
  0x3d   : > { %v174_v3 = vsub.s32 4, %v162_v2  ;;  %vm163_vm0 = vcmp.eq.s32.totalorder %v162_v2, 0  ;;  %vm165_vm1 = vcmp.eq.s32.totalorder %v162_v2, 1  ;;  %vm167_vm2 = vcmp.eq.s32.totalorder %v162_v2, 2 }
  0x3e   : > { %v164_v4 = vsel %vm163_vm0, 0.1, %v559_v1  ;;  %vm169_vm3 = vcmp.eq.s32.totalorder %v162_v2, 3 }
  0x3f   : > { %v166_v5 = vsel %vm165_vm1, 0.5, %v164_v4  ;;  %v175_v8 = vrot.slane %v171_v6, %v174_v3 }
  0x40   : > { %v168_v7 = vsel %vm167_vm2, 0.9, %v166_v5 }
  0x41   : > { %v170_v9 = vsel %vm169_vm3, 0.95, %v168_v7  ;;  %v176_v10 = vsub.f32 %v175_v8, %v171_v6  ;;  %187 = sbr.rel (%p325_p12) target bundleno = 76 (0x4c), region = 36  ;;  %v188_v15 = vld [vmem:[#allocation2] sm:$0x1f] (!%p325_p12) }
  0x43   : > { %v177_v11 = vmul.f32 %v176_v10, %v170_v9  ;;  %v178_v12 = vsub.f32 0.0, %v176_v10 }
  0x45   : > { %v179_v13 = vmax.f32 %v178_v12, 0.0 }
  0x47   : > { %v180_v14 = vadd.f32 %v179_v13, %v177_v11 }
  0x49   : > { %v189_v16 = vadd.f32 %v188_v15, %v180_v14 }
  0x4b   : > { %190 = vst [vmem:[#allocation2] sm:$0x1f] %v189_v16 }
  0x4c PF: > { %p326_p0 = scmp.le.s32.totalorder %s333_s28, 32 }
  0x4d   : > { %v196_v17 = vand.u32 (!%p326_p0), 127, %v161_v0  ;;  %v198_v18 = vstv (!%p326_p0), %s680_s26 }
  0x4e   : > { %194 = sbr.rel (%p326_p0) target bundleno = 86 (0x56), region = 40 }
  0x4f   : > { %v199_v19 = vadd.s32 (!%p326_p0), %v198_v18, %v196_v17 }
  0x51   : > { %vm200_vm4 = vcmp.lt.s32.totalorder (!%p326_p0), %v199_v19, 32 }
  0x52   : > { %v201_v20 = vld [vmem:[#allocation2] sm:$0x1f] (!%p326_p0)  ;;  %v202_v21 = vsel (!%p326_p0), %vm200_vm4, %v180_v14, 0.0 }
  0x53   : > { %v203_v22 = vadd.f32 (!%p326_p0), %v202_v21, %v201_v20 }
  0x55   : > { %204 = vst [vmem:[#allocation2] sm:$0x1f] %v203_v22 }
  0x56 PF: > { %vm209_vm5 = vcmask 1044480   ;;  %s237_s18 = sshll.u32 %s152_s11, 4  ;;  %s695_s2 = scalar_lea.hbm %s753_s1, %s680_s26  ;;  %s697_s18 = int_to_ptr.vmem [resolvable:$true] %s237_s18 }
  0x57   : > { %s224_s4 = scalar_lea.sflag [#allocation5], %s150_s25  ;;  %s453_s5 = scalar_lea.vmem %s697_s18, 128 }
  0x58   : > { %p454_p2 = scmp.ne.s32.totalorder %s697_s18, %s453_s5  ;;  %p766_p3 = scmp.ne.s32.totalorder %s759_s22, 0 }
  0x59   : > { %s560_s9 = smov [#allocation6]  }
  0x5a   : > { %p455_p5 = pnand %p454_p2, %p766_p3  ;;  %s457_s14 = sshll.u32 %s560_s9, 4  ;;  %s458_s14 = int_to_ptr.vmem [resolvable:$false] %s457_s14 }
  0x5b   : > { %s459_s15 = scalar_lea.vmem %s458_s14, 256  ;;  %p460_p11 = scmp.lt.s32.totalorder %s697_s18, %s458_s14 }
  0x5c   : > { %v208_v23 = vld [vmem:[#allocation2] sm:$0x1f]  ;;  %p456_p8 = pneg %p455_p5  ;;  %p461_p1 = scmp.lt.s32.totalorder %s459_s15, %s453_s5 }
  0x5d   : > { %v210_v24 = vsel %vm209_vm5, %v208_v23, 0.0 }
  0x5e   : > { %211 = vadd.xlane.f32.xlu0 %v210_v24  ;;  %p462_p7 = por %p461_p1, %p460_p11 }
  0x60   : > { %p463_p9 = pnand %p462_p7, %p456_p8 }
  0xeb   : > { %v212_v25 = vpop.xlane.xlu0 %211 }
  0xec   : > { %v213_v26 = vrot.slane %v212_v25, 4 }
  0xee   : > { %v214_v27 = vadd.f32 %v213_v26, %v212_v25 }
  0xf0   : > { %v215_v28 = vrot.slane %v214_v27, 2 }
  0xf2   : > { %v216_v29 = vadd.f32 %v215_v28, %v214_v27 }
  0xf4   : > { %v217_v30 = vrot.slane %v216_v29, 1 }
  0xf6   : > { %v218_v31 = vadd.f32 %v217_v30, %v216_v29 }
  0xf8   : > { %334 = vpush %v218_v31 }
 0x129   : > { %s335_s3 = spop %334 }
 0x12a   : > { %v220_v32 = vstv %s335_s3 }
 0x12b   : > { %222 = vst [vmem:[%s152_s11] sm:$0xff] %v220_v32 }
 0x12c   : > { %466 = shalt.err (!%p463_p9)
}
 0x12d   : > { %s467_s17 = scalar_lea.hbm %s695_s2, 128  ;;  %s471_s24 = scalar_lea.hbm %s753_s1, 256 }
 0x12e   : > { %p468_p10 = scmp.ne.s32.totalorder %s695_s2, %s467_s17  ;;  %p472_p6 = scmp.lt.u32.totalorder %s695_s2, %s753_s1 }
 0x12f   : > { %p473_p12 = scmp.lt.u32.totalorder %s471_s24, %s467_s17  ;;  %p475_p2 = scmp.lt.u32.totalorder %s467_s17, %s695_s2 }
 0x130   : > { %p469_p13 = pnand %p468_p10, %p766_p3 }
 0x131   : > { %p474_p0 = por %p473_p12, %p472_p6 }
 0x132   : > { %p470_p4 = pneg %p469_p13 }
 0x133   : > { %p476_p5 = por %p475_p2, %p474_p0 }
 0x135   : > { %p477_p8 = pnand %p476_p5, %p470_p4 }
 0x137   : > { %480 = shalt.err (!%p477_p8)
}
 0x138   : > { %338 = dma.vmem_to_hbm [thread:$0]  (%p766_p3), %s697_s18, 128, %s695_s2, %s224_s4  }
 0x139 PF: > { %s249_s27 = sand.u32 1, %s528_s6   ;;  %p767_p11 = scmp.ne.s32.totalorder %s760_s23, 0 }
 0x13a   : > { %p768_p1 = scmp.ge.s32.totalorder %s556_s13, 2  ;;  %s250_s28 = scalar_lea.sflag [#allocation5], %s249_s27 }
 0x13c   : > { %p345_p7 = pnand %p768_p1, %p767_p11 }
 0x13e   : > { %522 = dma.done.wait (!%p345_p7), %s250_s28, 128  }
 0x13f   : > { %524 = vsyncadd (!%p345_p7), %s250_s28, 4294967168  ;;  %s17_s13 = sadd.s32 1, %s556_s13   ;;  %s769_s6 = smov %s532_s7 }
 0x140   : > { %p14_p9 = scmp.ge.s32.totalorder %s17_s13, 4   ;;  %s770_s7 = smov %s536_s8 }
 0x141   : > { %s771_s8 = smov %s629_s21  ;;  %s772_s9 = smov %s544_s10 }
 0x142   : > { %s742_s10 = smov 0   ;;  %s773_s11 = smov %s552_s12 }
 0x143   : > { %s774_s12 = smov %s776_s16  ;;  %16 = sbr.rel (!%p14_p9) target bundleno = 7 (0x7), region = 85 }
 0x14a   :  { %255 = vsyncpa [#allocation4], 1 }
 0x14b   :  { %257 = vsyncpa [#allocation4 + $0x1], 1 }
 0x14c   :  { %258 = vsyncpa [#allocation5], 1 }
 0x14d   :  { %260 = vsyncpa [#allocation5 + $0x1], 1 }

</bundles_post_ra>
